<compile_context>
chip_gen: v6e
topology: v6e:2x2x1
jax: 0.10.0
libtpu: 0.0.40
codegen_flags: <defaults>
</compile_context>

<pallas_src>
import functools

import jax
import jax.numpy as jnp
from jax.experimental import pallas as pl
from jax.experimental.pallas import tpu as pltpu

RMS_EPS = 1e-5
VMEM_LIMIT = 48 * 1024 * 1024   # safe on v5e/v6e (128 MiB) and v7x (64 MiB)


def _pick_tile(dim, target):
    """Use `target` when it divides dim, else fall back to the full dim."""
    return target if dim % target == 0 else dim


# ------------------------------------------- fused RMSNorm + matmul (QKV) ----
def _rmsnorm_matmul_kernel(x_ref, g_ref, w_ref, o_ref, *, eps):
    x = x_ref[...].astype(jnp.float32)                       # (tm, K)
    var = jnp.mean(x * x, axis=-1, keepdims=True)
    xn = x * jax.lax.rsqrt(var + eps) * g_ref[...].astype(jnp.float32)
    o_ref[...] = jnp.dot(xn.astype(w_ref.dtype), w_ref[...],
                         preferred_element_type=jnp.float32).astype(o_ref.dtype)


def rmsnorm_matmul(x2d, gamma, w, *, eps=RMS_EPS):
    M, K = x2d.shape
    _, N = w.shape
    tm = _pick_tile(M, 128)
    tn = _pick_tile(N, 256)
    kern = functools.partial(_rmsnorm_matmul_kernel, eps=eps)
    return pl.pallas_call(
        kern,
        out_shape=jax.ShapeDtypeStruct((M, N), x2d.dtype),
        grid=(M // tm, N // tn),
        in_specs=[pl.BlockSpec((tm, K), lambda i, j: (i, 0)),
                  pl.BlockSpec((1, K), lambda i, j: (0, 0)),
                  pl.BlockSpec((K, tn), lambda i, j: (0, j))],
        out_specs=pl.BlockSpec((tm, tn), lambda i, j: (i, j)),
        compiler_params=pltpu.CompilerParams(
            dimension_semantics=("parallel", "parallel"),
            vmem_limit_bytes=VMEM_LIMIT),
        cost_estimate=pl.CostEstimate(
            flops=2 * M * N * K, transcendentals=M,
            bytes_accessed=2 * (M * K + K * N + M * N)),
    )(x2d, gamma.reshape(1, K), w)


# ------------------------------------- tiled matmul with fused residual ------
def _matmul_residual_kernel(x_ref, w_ref, r_ref, o_ref, acc_ref):
    k = pl.program_id(2)

    @pl.when(k == 0)
    def _():
        acc_ref[...] = jnp.zeros_like(acc_ref)

    acc_ref[...] += jnp.dot(x_ref[...], w_ref[...],
                            preferred_element_type=jnp.float32)

    @pl.when(k == pl.num_programs(2) - 1)
    def _():
        o_ref[...] = (acc_ref[...] + r_ref[...].astype(jnp.float32)
                      ).astype(o_ref.dtype)


def matmul_residual(x2d, w, res2d):
    M, K = x2d.shape
    _, N = w.shape
    tm = _pick_tile(M, 128)
    tn = _pick_tile(N, 256)
    tk = _pick_tile(K, 512)
    return pl.pallas_call(
        _matmul_residual_kernel,
        out_shape=jax.ShapeDtypeStruct((M, N), res2d.dtype),
        grid=(M // tm, N // tn, K // tk),
        in_specs=[pl.BlockSpec((tm, tk), lambda i, j, k: (i, k)),
                  pl.BlockSpec((tk, tn), lambda i, j, k: (k, j)),
                  pl.BlockSpec((tm, tn), lambda i, j, k: (i, j))],
        out_specs=pl.BlockSpec((tm, tn), lambda i, j, k: (i, j)),
        scratch_shapes=[pltpu.VMEM((tm, tn), jnp.float32)],
        compiler_params=pltpu.CompilerParams(
            dimension_semantics=("parallel", "parallel", "arbitrary"),
            vmem_limit_bytes=VMEM_LIMIT),
        cost_estimate=pl.CostEstimate(
            flops=2 * M * N * K, transcendentals=0,
            bytes_accessed=2 * (M * K + K * N + 2 * M * N)),
    )(x2d, w, res2d)


# -------------------------- flash attention (RoPE + causal + GQA fused) ------
def _flash_attn_kernel(q_ref, k_ref, v_ref, cq_ref, sq_ref, ck_ref, sk_ref,
                       o_ref, m_sc, l_sc, acc_sc, q_sc, *, scale, tq, tk, half):
    qi = pl.program_id(2)
    ki = pl.program_id(3)

    def rotate_half(x):
        # HF rotate_half: concat(-x[..., half:], x[..., :half]) along lanes.
        # (concat is used instead of pltpu.roll: roll requires a non-negative
        #  axis and concat is portable in interpret mode as well.)
        return jnp.concatenate([-x[:, half:], x[:, :half]], axis=-1)

    def rope(x, cos, sin):
        return x * cos + rotate_half(x) * sin

    @pl.when(ki == 0)
    def _():
        m_sc[...] = jnp.full(m_sc.shape, -jnp.inf, m_sc.dtype)
        l_sc[...] = jnp.zeros_like(l_sc)
        acc_sc[...] = jnp.zeros_like(acc_sc)
        # q-side RoPE + softmax scale done once per q tile (not per kv tile).
        q = rope(q_ref[0].astype(jnp.float32),
                 cq_ref[...].astype(jnp.float32),
                 sq_ref[...].astype(jnp.float32)) * scale
        q_sc[...] = q.astype(q_sc.dtype)

    # skip kv tiles that lie entirely above the causal diagonal
    @pl.when(ki * tk <= qi * tq + (tq - 1))
    def _():
        k = rope(k_ref[0].astype(jnp.float32),
                 ck_ref[...].astype(jnp.float32),
                 sk_ref[...].astype(jnp.float32))
        v = v_ref[0]

        s = jax.lax.dot_general(
            q_sc[...], k.astype(q_sc.dtype),
            dimension_numbers=(((1,), (1,)), ((), ())),
            preferred_element_type=jnp.float32)                 # (tq, tk)

        row = qi * tq + jax.lax.broadcasted_iota(jnp.int32, (tq, tk), 0)
        col = ki * tk + jax.lax.broadcasted_iota(jnp.int32, (tq, tk), 1)
        s = jnp.where(col <= row, s, -jnp.inf)

        m_prev = m_sc[...]
        m_new = jnp.maximum(m_prev, jnp.max(s, axis=-1, keepdims=True))
        alpha = jnp.exp(m_prev - m_new)
        p = jnp.exp(s - m_new)
        l_sc[...] = alpha * l_sc[...] + jnp.sum(p, axis=-1, keepdims=True)
        acc_sc[...] = alpha * acc_sc[...] + jnp.dot(
            p.astype(v.dtype), v, preferred_element_type=jnp.float32)
        m_sc[...] = m_new

    @pl.when(ki == pl.num_programs(3) - 1)
    def _():
        o_ref[...] = ((acc_sc[...] / l_sc[...]).astype(o_ref.dtype))[None]


def flash_attention(qkv3, cos, sin, *, n_heads, n_kv_heads, head_dim):
    # qkv3: (B, S, (n_heads + 2*n_kv_heads) * head_dim) — raw fused-QKV output.
    B, S, _ = qkv3.shape
    D = head_dim
    n_rep = n_heads // n_kv_heads
    tq = _pick_tile(S, 128)
    tk = _pick_tile(S, 128)
    scale = 1.0 / (D ** 0.5)

    q_spec = pl.BlockSpec((1, tq, D), lambda b, h, qi, ki: (b, qi, h))
    k_spec = pl.BlockSpec((1, tk, D),
                          lambda b, h, qi, ki: (b, ki, n_heads + h // n_rep))
    v_spec = pl.BlockSpec(
        (1, tk, D),
        lambda b, h, qi, ki: (b, ki, n_heads + n_kv_heads + h // n_rep))
    cq_spec = pl.BlockSpec((tq, D), lambda b, h, qi, ki: (qi, 0))
    sq_spec = pl.BlockSpec((tq, D), lambda b, h, qi, ki: (qi, 0))
    ck_spec = pl.BlockSpec((tk, D), lambda b, h, qi, ki: (ki, 0))
    sk_spec = pl.BlockSpec((tk, D), lambda b, h, qi, ki: (ki, 0))
    o_spec = pl.BlockSpec((1, tq, D), lambda b, h, qi, ki: (b, qi, h))

    kern = functools.partial(_flash_attn_kernel, scale=scale, tq=tq, tk=tk,
                             half=D // 2)
    return pl.pallas_call(
        kern,
        out_shape=jax.ShapeDtypeStruct((B, S, n_heads * D), qkv3.dtype),
        grid=(B, n_heads, S // tq, S // tk),
        in_specs=[q_spec, k_spec, v_spec, cq_spec, sq_spec, ck_spec, sk_spec],
        out_specs=o_spec,
        scratch_shapes=[pltpu.VMEM((tq, 1), jnp.float32),
                        pltpu.VMEM((tq, 1), jnp.float32),
                        pltpu.VMEM((tq, D), jnp.float32),
                        pltpu.VMEM((tq, D), qkv3.dtype)],
        compiler_params=pltpu.CompilerParams(
            dimension_semantics=("parallel", "parallel", "parallel",
                                 "arbitrary"),
            vmem_limit_bytes=VMEM_LIMIT),
        cost_estimate=pl.CostEstimate(
            flops=4 * B * n_heads * S * S * D,
            transcendentals=B * n_heads * S * S,
            bytes_accessed=4 * qkv3.size * qkv3.dtype.itemsize),
    )(qkv3, qkv3, qkv3, cos, sin, cos, sin)


# ------------------------- MoE router: fused RMSNorm + gate + softmax/top-k --
def _moe_router_kernel(x_ref, g_ref, w_ref, o_ref, *, eps, top_k):
    x = x_ref[...].astype(jnp.float32)
    var = jnp.mean(x * x, axis=-1, keepdims=True)
    xn = x * jax.lax.rsqrt(var + eps) * g_ref[...].astype(jnp.float32)
    logits = jnp.dot(xn.astype(w_ref.dtype), w_ref[...],
                     preferred_element_type=jnp.float32)          # (tm, E)
    logits = logits - jnp.max(logits, axis=-1, keepdims=True)
    p = jnp.exp(logits)
    p = p / jnp.sum(p, axis=-1, keepdims=True)

    n_exp = p.shape[-1]
    col = jax.lax.broadcasted_iota(jnp.int32, p.shape, 1).astype(jnp.float32)
    remaining = p
    selected = jnp.zeros_like(p)
    for _ in range(top_k):                     # static top-k, unrolled
        m = jnp.max(remaining, axis=-1, keepdims=True)
        idx = jnp.min(jnp.where(remaining >= m, col, float(n_exp)),
                      axis=-1, keepdims=True)  # first index reaching the max
        hit = (col == idx).astype(jnp.float32)
        selected = selected + hit
        remaining = jnp.where(hit > 0, -jnp.inf, remaining)

    w_dense = p * selected
    w_dense = w_dense / jnp.sum(w_dense, axis=-1, keepdims=True)
    o_ref[...] = w_dense


def moe_router(h2d, gamma, w_router, *, top_k, eps=RMS_EPS):
    M, K = h2d.shape
    _, E = w_router.shape
    tm = _pick_tile(M, 128)
    kern = functools.partial(_moe_router_kernel, eps=eps, top_k=top_k)
    return pl.pallas_call(
        kern,
        out_shape=jax.ShapeDtypeStruct((M, E), jnp.float32),
        grid=(M // tm,),
        in_specs=[pl.BlockSpec((tm, K), lambda i: (i, 0)),
                  pl.BlockSpec((1, K), lambda i: (0, 0)),
                  pl.BlockSpec((K, E), lambda i: (0, 0))],
        out_specs=pl.BlockSpec((tm, E), lambda i: (i, 0)),
        compiler_params=pltpu.CompilerParams(
            dimension_semantics=("parallel",),
            vmem_limit_bytes=VMEM_LIMIT),
    )(h2d, gamma.reshape(1, K), w_router)


# ----------------- MoE experts: fused RMSNorm + SwiGLU + weighted accumulate -
def _moe_expert_kernel(h_ref, g_ref, w1_ref, w3_ref, w2_ref, rw_ref, o_ref,
                       acc_ref, *, eps):
    e = pl.program_id(1)

    @pl.when(e == 0)
    def _():
        acc_ref[...] = jnp.zeros_like(acc_ref)

    h = h_ref[...].astype(jnp.float32)                       # (tm, H)
    var = jnp.mean(h * h, axis=-1, keepdims=True)
    xn = h * jax.lax.rsqrt(var + eps) * g_ref[...].astype(jnp.float32)
    xb = xn.astype(w1_ref.dtype)

    gate = jnp.dot(xb, w1_ref[0], preferred_element_type=jnp.float32)
    up = jnp.dot(xb, w3_ref[0], preferred_element_type=jnp.float32)
    act = gate * jax.nn.sigmoid(gate) * up
    y = jnp.dot(act.astype(w2_ref.dtype), w2_ref[0],
                preferred_element_type=jnp.float32)

    rw = rw_ref[...]                                         # (tm, E)
    col = jax.lax.broadcasted_iota(jnp.int32, rw.shape, 1)
    rw_e = jnp.sum(jnp.where(col == e, rw, 0.0), axis=-1, keepdims=True)
    acc_ref[...] += rw_e * y

    @pl.when(e == pl.num_programs(1) - 1)
    def _():
        o_ref[...] = (acc_ref[...] + h).astype(o_ref.dtype)  # fused residual


def moe_experts(h2d, gamma, w1s, w3s, w2s, rw, *, eps=RMS_EPS):
    M, H = h2d.shape
    E, _, inter = w1s.shape
    tm = _pick_tile(M, 128)
    kern = functools.partial(_moe_expert_kernel, eps=eps)
    return pl.pallas_call(
        kern,
        out_shape=jax.ShapeDtypeStruct((M, H), h2d.dtype),
        grid=(M // tm, E),
        in_specs=[pl.BlockSpec((tm, H), lambda i, e: (i, 0)),
                  pl.BlockSpec((1, H), lambda i, e: (0, 0)),
                  pl.BlockSpec((1, H, inter), lambda i, e: (e, 0, 0)),
                  pl.BlockSpec((1, H, inter), lambda i, e: (e, 0, 0)),
                  pl.BlockSpec((1, inter, H), lambda i, e: (e, 0, 0)),
                  pl.BlockSpec((tm, E), lambda i, e: (i, 0))],
        out_specs=pl.BlockSpec((tm, H), lambda i, e: (i, 0)),
        scratch_shapes=[pltpu.VMEM((tm, H), jnp.float32)],
        compiler_params=pltpu.CompilerParams(
            dimension_semantics=("parallel", "arbitrary"),
            vmem_limit_bytes=VMEM_LIMIT),
        cost_estimate=pl.CostEstimate(
            flops=2 * M * E * 3 * H * inter,
            transcendentals=M * E * inter,
            bytes_accessed=2 * (3 * E * H * inter + 2 * M * H)),
    )(h2d, gamma.reshape(1, H), w1s, w3s, w2s, rw)


# --------------------------------------------------------- block forward ----
def mixtral_block_forward(x, params, *, n_heads, n_kv_heads, head_dim, top_k):
    B, S, H = x.shape
    q_dim = n_heads * head_dim
    kv_dim = n_kv_heads * head_dim
    T = B * S

    x2d = x.reshape(T, H)
    cos, sin = params["rope_cos"], params["rope_sin"]   # precomputed tables

    # --- attention branch: norm_1 fused into QKV; RoPE/causal/GQA in-kernel --
    qkv = rmsnorm_matmul(x2d, params["norm1_w"], params["w_qkv"])
    qkv3 = qkv.reshape(B, S, q_dim + 2 * kv_dim)          # metadata-only
    attn = flash_attention(qkv3, cos, sin, n_heads=n_heads,
                           n_kv_heads=n_kv_heads, head_dim=head_dim)
    # o_proj with the residual add fused into the matmul epilogue
    h2d = matmul_residual(attn.reshape(T, q_dim), params["w_o"], x2d)

    # --- MoE branch: norm_2 fused into router + expert prologues ------------
    rw = moe_router(h2d, params["norm2_w"], params["w_router"], top_k=top_k)
    out2d = moe_experts(h2d, params["norm2_w"], params["w1"], params["w3"],
                        params["w2"], rw)                 # residual fused
    return out2d.reshape(B, S, H)


# ------------------------------------------------------------------- main ----
if __name__ == "__main__":
    # small Mixtral-like config (lane-dense head_dim=128)
    B, S = 2, 8
    hidden_size = 256
    n_heads = 2
    n_kv_heads = 1
    head_dim = hidden_size // n_heads           # 128
    intermediate = 512
    n_experts = 4
    top_k = 2
    rope_theta = 1e6
    max_seq_len = 16

    q_dim = n_heads * head_dim
    kv_dim = n_kv_heads * head_dim

    key = jax.random.PRNGKey(0)
    keys = jax.random.split(key, 10)
    dt = jnp.bfloat16

    def rnd(k, shape, scale=0.05):
        return (scale * jax.random.normal(k, shape, jnp.float32)).astype(dt)

    # RoPE tables precomputed once (shared across layers / calls).
    # TODO(synk): rotate-half (HF) layout assumed; verify against checkpoint
    #             if it uses the interleaved complex layout.
    inv_freq = 1.0 / (rope_theta ** (
        jnp.arange(0, head_dim, 2, dtype=jnp.float32) / head_dim))
    pos = jnp.arange(max_seq_len, dtype=jnp.float32)
    ang = pos[:, None] * inv_freq[None, :]
    rope_cos = jnp.concatenate([jnp.cos(ang), jnp.cos(ang)], axis=-1)
    rope_sin = jnp.concatenate([jnp.sin(ang), jnp.sin(ang)], axis=-1)

    params = {
        "norm1_w": 1.0 + 0.01 * jax.random.normal(keys[0], (hidden_size,),
                                                  jnp.float32),
        "norm2_w": 1.0 + 0.01 * jax.random.normal(keys[1], (hidden_size,),
                                                  jnp.float32),
        "w_qkv": rnd(keys[2], (hidden_size, q_dim + 2 * kv_dim)),
        "w_o": rnd(keys[3], (q_dim, hidden_size)),
        "w_router": rnd(keys[4], (hidden_size, n_experts), scale=0.5),
        "w1": rnd(keys[5], (n_experts, hidden_size, intermediate)),
        "w3": rnd(keys[6], (n_experts, hidden_size, intermediate)),
        "w2": rnd(keys[7], (n_experts, intermediate, hidden_size)),
        "rope_cos": rope_cos,
        "rope_sin": rope_sin,
    }

    x = jax.random.normal(keys[8], (B, S, hidden_size), jnp.float32).astype(dt)

    out = mixtral_block_forward(x, params, n_heads=n_heads,
                                n_kv_heads=n_kv_heads, head_dim=head_dim,
                                top_k=top_k)
    out = jax.block_until_ready(out)
    assert out.shape == (B, S, hidden_size)
    assert bool(jnp.all(jnp.isfinite(out.astype(jnp.float32))))
    print("KERNEL_OK")
</pallas_src>

<mosaic_0001>
module attributes {stable_mosaic.version = 11 : i64} {
  func.func @_rmsnorm_matmul_kernel(%arg0: i32, %arg1: i32, %arg2: memref<16x256xbf16, #tpu.memory_space<vmem>>, %arg3: memref<1x256xf32, #tpu.memory_space<vmem>>, %arg4: memref<256x256xbf16, #tpu.memory_space<vmem>>, %arg5: memref<16x256xbf16, #tpu.memory_space<vmem>>) attributes {dimension_semantics = [#tpu.dimension_semantics<parallel>, #tpu.dimension_semantics<parallel>], iteration_bounds = array<i64: 1, 2>, scalar_prefetch = 0 : i64, scratch_operands = 0 : i64, tpu.core_type = #tpu.core_type<tc>, window_params = [{transform_indices = @transform_0, window_bounds = array<i64: 16, 256>}, {pipeline_mode = #tpu.pipeline_mode<synchronous>, transform_indices = @transform_1, window_bounds = array<i64: 1, 256>}, {transform_indices = @transform_2, window_bounds = array<i64: 256, 256>}, {transform_indices = @transform_3, window_bounds = array<i64: 16, 256>}]} {
    %c0 = arith.constant 0 : index
    %c0_0 = arith.constant 0 : index
    %0 = vector.load %arg2[%c0, %c0_0] : memref<16x256xbf16, #tpu.memory_space<vmem>>, vector<16x256xbf16>
    %1 = arith.extf %0 : vector<16x256xbf16> to vector<16x256xf32>
    %2 = arith.mulf %1, %1 : vector<16x256xf32>
    %cst = arith.constant dense<0.000000e+00> : vector<16xf32>
    %3 = vector.multi_reduction <add>, %2, %cst [1] : vector<16x256xf32> to vector<16xf32>
    %4 = vector.shape_cast %3 : vector<16xf32> to vector<16x1xf32>
    %cst_1 = arith.constant 2.560000e+02 : f32
    %5 = vector.broadcast %cst_1 : f32 to vector<16x1xf32>
    %6 = arith.divf %4, %5 : vector<16x1xf32>
    %cst_2 = arith.constant 9.99999974E-6 : f32
    %7 = vector.broadcast %cst_2 : f32 to vector<16x1xf32>
    %8 = arith.addf %6, %7 : vector<16x1xf32>
    %9 = math.rsqrt %8 : vector<16x1xf32>
    %10 = vector.broadcast %9 : vector<16x1xf32> to vector<16x256xf32>
    %11 = arith.mulf %1, %10 : vector<16x256xf32>
    %c0_3 = arith.constant 0 : index
    %c0_4 = arith.constant 0 : index
    %12 = vector.load %arg3[%c0_3, %c0_4] : memref<1x256xf32, #tpu.memory_space<vmem>>, vector<1x256xf32>
    %13 = vector.broadcast %12 : vector<1x256xf32> to vector<16x256xf32>
    %14 = arith.mulf %11, %13 : vector<16x256xf32>
    %15 = arith.truncf %14 : vector<16x256xf32> to vector<16x256xbf16>
    %c0_5 = arith.constant 0 : index
    %c0_6 = arith.constant 0 : index
    %16 = vector.load %arg4[%c0_5, %c0_6] : memref<256x256xbf16, #tpu.memory_space<vmem>>, vector<256x256xbf16>
    %cst_7 = arith.constant dense<0.000000e+00> : vector<16x256xf32>
    %17 = tpu.matmul %15, %16, %cst_7 {dimension_numbers = #tpu.dot_dimension_numbers<[1], [0], [0], [1], [0, 0, 1, 1], [], []>} : vector<16x256xbf16>, vector<256x256xbf16>, vector<16x256xf32> -> vector<16x256xf32>
    %18 = arith.truncf %17 : vector<16x256xf32> to vector<16x256xbf16>
    %c0_8 = arith.constant 0 : index
    %c0_9 = arith.constant 0 : index
    %19 = vector.load %arg5[%c0_8, %c0_9] : memref<16x256xbf16, #tpu.memory_space<vmem>>, vector<16x256xbf16>
    tpu.vector_store %arg5[%c0_8, %c0_9], %18 {strides = array<i32>} : memref<16x256xbf16, #tpu.memory_space<vmem>>, vector<16x256xbf16>,
    return
  }
  func.func @transform_0(%arg0: i32, %arg1: i32) -> (i32, i32) {
    %c0_i32 = arith.constant 0 : i32
    %c0_i32_0 = arith.constant 0 : i32
    return %arg0, %c0_i32 : i32, i32
  }
  func.func @transform_1(%arg0: i32, %arg1: i32) -> (i32, i32) {
    %c0_i32 = arith.constant 0 : i32
    %c0_i32_0 = arith.constant 0 : i32
    %c0_i32_1 = arith.constant 0 : i32
    return %c0_i32, %c0_i32_0 : i32, i32
  }
  func.func @transform_2(%arg0: i32, %arg1: i32) -> (i32, i32) {
    %c0_i32 = arith.constant 0 : i32
    %c0_i32_0 = arith.constant 0 : i32
    return %c0_i32, %arg1 : i32, i32
  }
  func.func @transform_3(%arg0: i32, %arg1: i32) -> (i32, i32) {
    %c0_i32 = arith.constant 0 : i32
    return %arg0, %arg1 : i32, i32
  }
}

</mosaic_0001>

<bundles_post_ra>
// kernel: tpu_custom_call.1
= control target key start
LH: loop header
LB: loop body
LE: loop exit
PB: predicated region body
PF: predicated region fallthrough
CT: control target
= control target key end

     0   :  { %s1308_s0 = inlined_call_operand.hbm [shape: bf16[16,256], index: 0, kind: input, shape index: {}]   ;;  %s1309_s1 = inlined_call_operand.hbm [shape: f32[1,256], index: 1, kind: input, shape index: {}]   ;;  %s1310_s2 = inlined_call_operand.hbm [shape: bf16[256,512], index: 2, kind: input, shape index: {}]   ;;  %s1311_s3 = inlined_call_operand.hbm [shape: bf16[16,512], index: 3, kind: output, shape index: {}]  }
   0x1   :  { %1316 = sst [smem:[#allocation13_spill]] %s1308_s0 }
   0x2   :  { %8 = vsyncpa [#allocation3], 0 }
   0x3   :  { %9 = vsyncpa [#allocation6], 0 }
   0x4   :  { %10 = vsyncpa [#allocation4], 0 }
   0x5   :  { %12 = vsyncpa [#allocation4 + $0x1], 0  ;;  %s1055_s12 = smov 0   ;;  %s1057_s13 = smov 0  }
   0x6   :  { %s1059_s14 = smov 0   ;;  %s1061_s15 = smov 0  }
   0x7   :  { %s1063_s16 = smov 0   ;;  %s1065_s17 = smov 0  }
   0x8 LB: > { %s1086_s18 = sadd.s32 4294967295, %s1023_s17   ;;  %s658_s19 = sadd.s32 4294967294, %s1023_s17   ;;  %s1023_s17 = sphi %s1065_s17, %s18_s17   ;;  %s1019_s16 = sphi %s1063_s16, %s1338_s16   ;;  %s1015_s15 = sphi %s1061_s15, %s1337_s15   ;;  %s1011_s14 = sphi %s1059_s14, %s1336_s14   ;;  %s1007_s13 = sphi %s1057_s13, %s1335_s13   ;;  %s1003_s12 = sphi %s1055_s12, %s1334_s12  }
   0x9   : > { %s84_s20 = sadd.s32 1, %s1011_s14  ;;  %p91_p0 = scmp.ne.s32.totalorder %s1011_s14, %s1007_s13 }
   0xa   : > { %p92_p1 = scmp.eq.s32.totalorder %s1023_s17, 0  ;;  %p97_p2 = scmp.ne.s32.totalorder %s1007_s13, %s1003_s12 }
   0xb   : > { %p1312_p3 = scmp.eq.s32.totalorder %s1086_s18, 0  ;;  %p123_p4 = scmp.eq.s32.totalorder %s1086_s18, 1 }
   0xc   : > { %p1097_p5 = por %p92_p1, %p91_p0  ;;  %p129_p6 = scmp.eq.s32.totalorder %s658_s19, 1 }
   0xd   : > { %p1103_p7 = por %p1312_p3, %p97_p2  ;;  %p1107_p8 = por %p123_p4, %p91_p0 }
   0xe   : > { %p1111_p9 = por %p129_p6, %p97_p2  ;;  %p659_p10 = scmp.ge.s32.totalorder %s1023_s17, 1 }
   0xf   : > { %s1319_s23 = scalar_select %p1107_p8, 1, 0 }
  0x10   : > { %s1320_s24 = scalar_select %p1111_p9, 1, 0 }
  0x11   : > { %p136_p11 = scmp.lt.s32.totalorder %s1023_s17, 3  ;;  %s1025_s26 = smov [#allocation2]  }
  0x12   : > { %s152_s27 = sshll.u32 %s1025_s26, 4  ;;  %p743_p1 = scmp.lt.s32.totalorder %s1023_s17, 2  ;;  %s153_s27 = int_to_ptr.vmem [resolvable:$true] %s152_s27 }
  0x13   : > { %p1117_p12 = pnand %p659_p10, %p136_p11  ;;  %s1026_s29 = smov [#allocation5]  }
  0x14   : > { %s166_s30 = sshll.u32 %s1026_s29, 4  ;;  %p1133_p2 = pnand %p743_p1, %p1097_p5  ;;  %s167_s30 = int_to_ptr.vmem [resolvable:$true] %s166_s30 }
  0x15   : > { %p726_p13 = pneg %p1117_p12  ;;  %s866_s5 = scalar_lea.vmem %s153_s27, 256 }
  0x16   : > { %p867_p10 = scmp.ne.s32.totalorder %s153_s27, %s866_s5  ;;  %p874_p0 = scmp.lt.s32.totalorder %s153_s27, %s153_s27 }
  0x17   : > { %p1127_p4 = pnand %p726_p13, %p1312_p3  ;;  %p875_p3 = scmp.lt.s32.totalorder %s866_s5, %s866_s5 }
  0x19   : > { %p857_p6 = pneg %p1127_p4  ;;  %p876_p9 = por %p875_p3, %p874_p0 }
  0x1b   : > { %p869_p11 = pnand %p867_p10, %p857_p6 }
  0x1d   : > { %p870_p13 = pneg %p869_p11 }
  0x1f   : > { %p877_p8 = pnand %p876_p9, %p870_p13 }
  0x21   : > { %880 = shalt.err (!%p877_p8)
}
  0x22   : > { %s1314_s6 = smov 128   ;;  %s1315_s7 = smov 8  }
  0x23   : > { %s1324_s0 = sld [smem:[#allocation13_spill]]  ;;  %s892_s10 = scalar_lea.vmem %s167_s30, 32 }
  0x24   : > { %p893_p5 = scmp.ne.s32.totalorder %s167_s30, %s892_s10  ;;  %p900_p9 = scmp.lt.s32.totalorder %s167_s30, %s167_s30 }
  0x25   : > { %p901_p8 = scmp.lt.s32.totalorder %s892_s10, %s892_s10 }
  0x26   : > { %p895_p1 = pnand %p893_p5, %p857_p6 }
  0x27   : > { %p902_p0 = por %p901_p8, %p900_p9 }
  0x28   : > { %p896_p3 = pneg %p895_p1 }
  0x29   : > { %729 = dma.hbm_to_vmem [thread:$0]  (!%p1127_p4), %s1324_s0, 256, %s153_s27, [#allocation3], %s1314_s6, %s1314_s6, %s1315_s7  }
  0x2a   : > { %p903_p10 = pnand %p902_p0, %p896_p3 }
  0x2c   : > { %906 = shalt.err (!%p903_p10)
}
  0x2d   : > { %732 = dma.hbm_to_vmem [thread:$0]  (!%p1127_p4), %s1309_s1, 32, %s167_s30, [#allocation6]  }
  0x2e   : > { %s27_s21 = sadd.s32 1, %s1019_s16  ;;  %s177_s26 = sand.u32 1, %s1023_s17  }
  0x2f   : > { %p28_p6 = scmp.ge.s32.totalorder %s27_s21, 2  ;;  %s179_s27 = sand.u32 1, %s1011_s14  }
  0x30   : > { %s710_s29 = sshll.u32 %s1019_s16, 7  ;;  %s663_s28 = sshll.u32 %s179_s27, 8 }
  0x31   : > { %s1340_s21 = smov (%p28_p6, %s27_s21), 0  ;;  %s187_s9 = scalar_lea.hbm %s1310_s2, %s710_s29 }
  0x32   : > { %s81_s10 = ssub.s32 %s1019_s16, %s1340_s21  ;;  %s181_s11 = scalar_lea.vmem [#allocation7], %s663_s28 }
  0x33   : > { %p82_p11 = scmp.eq.s32.totalorder %s81_s10, 0  ;;  %s188_s19 = sshll.u32 %s181_s11, 4  ;;  %s189_s19 = int_to_ptr.vmem [resolvable:$true] %s188_s19 }
  0x34   : > { %s178_s6 = scalar_lea.sflag [#allocation3], %s177_s26  ;;  %p909_p4 = pneg %p1133_p2 }
  0x35   : > { %s1172_s30 = scalar_select %p82_p11, %s1011_s14, %s84_s20  }
  0x36   : > { %s920_s7 = scalar_lea.vmem %s189_s19, 4096  ;;  %s1029_s27 = smov [#allocation7]  }
  0x37   : > { %p921_p13 = scmp.ne.s32.totalorder %s189_s19, %s920_s7  ;;  %s925_s0 = sshll.u32 %s1029_s27, 4  ;;  %s926_s0 = int_to_ptr.vmem [resolvable:$false] %s925_s0 }
  0x38   : > { %s927_s5 = scalar_lea.vmem %s926_s0, 8192  ;;  %p928_p3 = scmp.lt.s32.totalorder %s189_s19, %s926_s0 }
  0x39   : > { %p923_p5 = pnand %p921_p13, %p909_p4  ;;  %p929_p9 = scmp.lt.s32.totalorder %s927_s5, %s920_s7 }
  0x3b   : > { %p924_p1 = pneg %p923_p5  ;;  %p930_p8 = por %p929_p9, %p928_p3 }
  0x3d   : > { %p931_p0 = pnand %p930_p8, %p924_p1 }
  0x3f   : > { %934 = shalt.err (!%p931_p0)
}
  0x40   : > { %s1030_s29 = smov 256   ;;  %s1325_s20 = smov 8  }
  0x41   : > { %s1326_s26 = smov 128   ;;  %200 = sbr.rel (%p1117_p12) target bundleno = 469 (0x1d5), region = 32 }
  0x42   : > { %736 = dma.hbm_to_vmem [thread:$0]  (!%p1133_p2), %s187_s9, 4096, %s189_s19, %s178_s6, %s1030_s29, %s1326_s26, %s1325_s20  }
  0x43   : > { %p1327_p10 = scmp.eq.s32.totalorder (!%p1117_p12), %s1086_s18, 0 }
  0x46   : > { %986 = dma.done.wait (%p1327_p10), [#allocation3], 256   ;;  %p1328_p6 = pmov %p1327_p10 }
  0x48   : > { %988 = vsyncadd (%p1328_p6), [#allocation3], 4294967040  ;;  %p1329_p11 = pmov %p1328_p6 }
  0x49   : > { %p1330_p4 = pmov %p1328_p6 }
  0x4a   : > { %990 = dma.done.wait (%p1329_p11), [#allocation6], 32  }
  0x4b   : > { %992 = vsyncadd (%p1330_p4), [#allocation6], 4294967264  ;;  %s210_s0 = sand.u32 1, %s1086_s18   ;;  %s1192_s4 = sand.u32 1, %s1007_s13  }
  0x4c   : > { %s669_s25 = sshll.u32 %s1192_s4, 8  ;;  %s211_s6 = scalar_lea.sflag [#allocation3], %s210_s0 }
  0x4d   : > { %s1195_s7 = scalar_lea.vmem [#allocation7], %s669_s25 }
  0x4e   : > { %994 = dma.done.wait (%p1103_p7), %s211_s6, 4096  }
  0x4f   : > { %996 = vsyncadd (%p1103_p7), %s211_s6, 4294963200  ;;  %v241_v0 = vld [vmem:[#allocation2] sm:$0xff]  ;;  %v242_v1 = vld [vmem:[#allocation2 + $0x8] sm:$0xff]  ;;  %v270_v50 = vlaneseq  ;;  %s670_s18 = sshll.u32 %s1192_s4, 4  ;;  %s713_s8 = sshll.u32 %s1015_s15, 7 }
  0x50   : > { %v1201_v2 = vunpack.c.l.bf16 %v241_v0  ;;  %v1203_v3 = vunpack.c.h.bf16 %v241_v0  ;;  %v1205_v4 = vunpack.c.l.bf16 %v242_v1  ;;  %v1207_v5 = vunpack.c.h.bf16 %v242_v1  ;;  %v803_v6 = vld [vmem:[%s1195_s7 + $0x74] ss:$8 sps:$4 sm:$0xff]   ;;  %v805_v7 = vld [vmem:[%s1195_s7 + $0x70] ss:$8 sps:$4 sm:$0xff]   ;;  %v806_v8 = vld [vmem:[%s1195_s7 + $0x64] ss:$8 sps:$4 sm:$0xff]   ;;  %s1260_s11 = scalar_lea.hbm %s1311_s3, %s713_s8 }
  0x51   : > { %478 = vmatprep.subr.bf16.mxu0 %v803_v6  ;;  %v808_v13 = vld [vmem:[%s1195_s7 + $0x60] ss:$8 sps:$4 sm:$0xff]   ;;  %v809_v15 = vld [vmem:[%s1195_s7 + $0x54] ss:$8 sps:$4 sm:$0xff]   ;;  %v811_v17 = vld [vmem:[%s1195_s7 + $0x50] ss:$8 sps:$4 sm:$0xff]  }
  0x52   : > { %v247_v9 = vmul.f32 %v1201_v2, %v1201_v2  ;;  %v248_v10 = vmul.f32 %v1203_v3, %v1203_v3  ;;  %v249_v11 = vmul.f32 %v1205_v4, %v1205_v4  ;;  %v250_v12 = vmul.f32 %v1207_v5, %v1207_v5  ;;  %479 = vmatpush1.bf16.msra.mxu0 %v805_v7  ;;  %v812_v18 = vld [vmem:[%s1195_s7 + $0x44] ss:$8 sps:$4 sm:$0xff]   ;;  %v814_v19 = vld [vmem:[%s1195_s7 + $0x40] ss:$8 sps:$4 sm:$0xff]   ;;  %v815_v20 = vld [vmem:[%s1195_s7 + $0x34] ss:$8 sps:$4 sm:$0xff]  }
  0x53   : > { %480 = vmatprep.subr.bf16.mxu0 %v806_v8  ;;  %v817_v21 = vld [vmem:[%s1195_s7 + $0x30] ss:$8 sps:$4 sm:$0xff]   ;;  %v818_v22 = vld [vmem:[%s1195_s7 + $0x24] ss:$8 sps:$4 sm:$0xff]   ;;  %v820_v23 = vld [vmem:[%s1195_s7 + $0x20] ss:$8 sps:$4 sm:$0xff]  }
  0x54   : > { %v251_v14 = vadd.f32 %v248_v10, %v247_v9  ;;  %v254_v16 = vadd.f32 %v250_v12, %v249_v11  ;;  %v821_v24 = vld [vmem:[%s1195_s7 + $0x14] ss:$8 sps:$4 sm:$0xff]   ;;  %v823_v25 = vld [vmem:[%s1195_s7 + $0x10] ss:$8 sps:$4 sm:$0xff]   ;;  %v824_v26 = vld [vmem:[%s1195_s7 + $0x4] ss:$8 sps:$4 sm:$0xff]  }
  0x55   : > { %v826_v27 = vld [vmem:[%s1195_s7] ss:$8 sps:$4 sm:$0xff]   ;;  %v827_v28 = vld [vmem:[%s1195_s7 + $0xf4] ss:$8 sps:$4 sm:$0xff]   ;;  %v829_v29 = vld [vmem:[%s1195_s7 + $0xf0] ss:$8 sps:$4 sm:$0xff]  }
  0x56   : > { %252 = vadd.xlane.f32.xlu0 %v251_v14  ;;  %481 = vmatpush1.bf16.msra.mxu0 %v808_v13  ;;  %v830_v30 = vld [vmem:[%s1195_s7 + $0xe4] ss:$8 sps:$4 sm:$0xff]   ;;  %v832_v31 = vld [vmem:[%s1195_s7 + $0xe0] ss:$8 sps:$4 sm:$0xff]   ;;  %v833_v32 = vld [vmem:[%s1195_s7 + $0xd4] ss:$8 sps:$4 sm:$0xff]  }
  0x57   : > { %482 = vmatprep.subr.bf16.mxu0 %v809_v15  ;;  %v835_v33 = vld [vmem:[%s1195_s7 + $0xd0] ss:$8 sps:$4 sm:$0xff]   ;;  %v836_v34 = vld [vmem:[%s1195_s7 + $0xc4] ss:$8 sps:$4 sm:$0xff]   ;;  %v838_v35 = vld [vmem:[%s1195_s7 + $0xc0] ss:$8 sps:$4 sm:$0xff]  }
  0x58   : > { %v839_v36 = vld [vmem:[%s1195_s7 + $0xb4] ss:$8 sps:$4 sm:$0xff]   ;;  %v841_v37 = vld [vmem:[%s1195_s7 + $0xb0] ss:$8 sps:$4 sm:$0xff]   ;;  %v842_v38 = vld [vmem:[%s1195_s7 + $0xa4] ss:$8 sps:$4 sm:$0xff]  }
  0x59   : > { %v844_v39 = vld [vmem:[%s1195_s7 + $0xa0] ss:$8 sps:$4 sm:$0xff]   ;;  %v845_v40 = vld [vmem:[%s1195_s7 + $0x94] ss:$8 sps:$4 sm:$0xff]   ;;  %v847_v41 = vld [vmem:[%s1195_s7 + $0x90] ss:$8 sps:$4 sm:$0xff]  }
  0x5a   : > { %255 = vadd.xlane.f32.xlu0 %v254_v16  ;;  %483 = vmatpush1.bf16.msra.mxu0 %v811_v17  ;;  %v848_v42 = vld [vmem:[%s1195_s7 + $0x84] ss:$8 sps:$4 sm:$0xff]   ;;  %v850_v43 = vld [vmem:[%s1195_s7 + $0x80] ss:$8 sps:$4 sm:$0xff]   ;;  %v271_v51 = vshrl.u32 %v270_v50, 7  ;;  %s236_s22 = scalar_lea.vmem [#allocation8], %s670_s18 }
  0x5b   : > { %484 = vmatprep.subr.bf16.mxu0 %v812_v18  ;;  %v268_v55 = vld [vmem:[#allocation5] sm:$0x3]  ;;  %s552_s28 = sshll.u32 %s236_s22, 4  ;;  %s536_s19 = scalar_lea.sflag [#allocation4], %s1192_s4  ;;  %s1255_s28 = int_to_ptr.vmem [resolvable:$true] %s552_s28 }
  0x5c   : > { %v272_v52 = vsub.s32 0, %v271_v51  ;;  %v276_v53 = vsub.s32 1, %v271_v51  ;;  %s935_s27 = scalar_lea.vmem %s1255_s28, 256  ;;  %p1331_p12 = scmp.ne.s32.totalorder %s1319_s23, 0 }
  0x5d   : > { %p936_p7 = scmp.ne.s32.totalorder %s1255_s28, %s935_s27  ;;  %s1031_s15 = smov [#allocation8]  }
  0x5e   : > { %485 = vmatpush1.bf16.msra.mxu0 %v814_v19  ;;  %v273_v57 = vrot.slane %v268_v55, %v272_v52  ;;  %v277_v58 = vrot.slane %v268_v55, %v276_v53  ;;  %s939_s5 = sshll.u32 %s1031_s15, 4  ;;  %s940_s5 = int_to_ptr.vmem [resolvable:$false] %s939_s5 }
  0x5f   : > { %486 = vmatprep.subr.bf16.mxu0 %v815_v20  ;;  %p937_p2 = pnand %p936_p7, %p1331_p12  ;;  %s941_s29 = scalar_lea.vmem %s940_s5, 512 }
  0x60   : > { %p942_p5 = scmp.lt.s32.totalorder %s1255_s28, %s940_s5  ;;  %p943_p1 = scmp.lt.s32.totalorder %s941_s29, %s935_s27 }
  0x61   : > { %p938_p13 = pneg %p937_p2 }
  0x62   : > { %487 = vmatpush1.bf16.msra.mxu0 %v817_v21  ;;  %p944_p3 = por %p943_p1, %p942_p5 }
  0x63   : > { %488 = vmatprep.subr.bf16.mxu0 %v818_v22 }
  0x64   : > { %p945_p9 = pnand %p944_p3, %p938_p13 }
  0x66   : > { %489 = vmatpush1.bf16.msra.mxu0 %v820_v23 }
  0x67   : > { %490 = vmatprep.subr.bf16.mxu0 %v821_v24 }
  0x6a   : > { %491 = vmatpush1.bf16.msra.mxu0 %v823_v25 }
  0x6b   : > { %492 = vmatprep.subr.bf16.mxu0 %v824_v26 }
  0x6e   : > { %493 = vmatpush1.bf16.msra.mxu0 %v826_v27 }
  0x6f   : > { %494 = vmatprep.subr.bf16.mxu0 %v827_v28 }
  0x72   : > { %495 = vmatpush2.bf16.msra.mxu0 %v829_v29 }
  0x73   : > { %496 = vmatprep.subr.bf16.mxu0 %v830_v30 }
  0x76   : > { %497 = vmatpush2.bf16.msra.mxu0 %v832_v31 }
  0x77   : > { %498 = vmatprep.subr.bf16.mxu0 %v833_v32 }
  0x7a   : > { %499 = vmatpush2.bf16.msra.mxu0 %v835_v33 }
  0x7b   : > { %500 = vmatprep.subr.bf16.mxu0 %v836_v34 }
  0x7e   : > { %501 = vmatpush2.bf16.msra.mxu0 %v838_v35 }
  0x7f   : > { %502 = vmatprep.subr.bf16.mxu0 %v839_v36 }
  0x82   : > { %503 = vmatpush2.bf16.msra.mxu0 %v841_v37 }
  0x83   : > { %504 = vmatprep.subr.bf16.mxu0 %v842_v38 }
  0x86   : > { %505 = vmatpush2.bf16.msra.mxu0 %v844_v39 }
  0x87   : > { %506 = vmatprep.subr.bf16.mxu0 %v845_v40 }
  0x8a   : > { %507 = vmatpush2.bf16.msra.mxu0 %v847_v41 }
  0x8b   : > { %508 = vmatprep.subr.bf16.mxu0 %v848_v42 }
  0x8e   : > { %509 = vmatpush2.bf16.msra.mxu0 %v850_v43 }
  0xdf   : > { %v253_v44 = vpop.xlane.xlu0 %252 }
  0xe0   : > { %v258_v45 = vmul.f32 0.00390625, %v253_v44 }
  0xe2   : > { %v260_v46 = vadd.f32 1e-05, %v258_v45 }
  0xe3   : > { %v256_v47 = vpop.xlane.xlu0 %255 }
  0xe4   : > { %851 = vrsqrt.f32 %v260_v46  ;;  %v259_v48 = vmul.f32 0.00390625, %v256_v47 }
  0xe6   : > { %v261_v49 = vadd.f32 1e-05, %v259_v48 }
  0xe8   : > { %853 = vrsqrt.f32 %v261_v49 }
  0xf1   : > { %v852_v54 = vpop.eup %851 }
  0xf2   : > { %v265_v56 = vmul.f32 %v852_v54, %v1203_v3  ;;  %v264_v59 = vmul.f32 %v852_v54, %v1201_v2 }
  0xf4   : > { %v281_v63 = vmul.f32 %v277_v58, %v265_v56  ;;  %v280_v1 = vmul.f32 %v273_v57, %v264_v59 }
  0xf5   : > { %v854_v60 = vpop.eup %853 }
  0xf6   : > { %v267_v61 = vmul.f32 %v854_v60, %v1207_v5  ;;  %v266_v62 = vmul.f32 %v854_v60, %v1205_v4 }
  0xf8   : > { %v283_v0 = vmul.f32 %v277_v58, %v267_v61  ;;  %v282_v6 = vmul.f32 %v273_v57, %v266_v62 }
  0xfa   : > { %v285_v7 = vpack.c.bf16 %v283_v0, %v281_v63  ;;  %v284_v8 = vpack.c.bf16 %v282_v6, %v280_v1 }
  0xfc   : > { %510 = vmatprep.mubr.bf16.mxu0 %v285_v7 }
  0xfd   : > { %511 = vmatmul.mubr.bf16.vlgmr.msra.gmra.mxu0 %v284_v8 }
 0x1bd   : > { %v512_v3 = vpop.f32.mrf.mxu0 }
 0x1bf   : > { %v514_v9 = vpop.f32.mrf.mxu0 }
 0x1c0   : > { %v711_v2 = vpack.c.bf16 %v514_v9, %v512_v3 }
 0x1c1   : > { %v516_v5 = vpop.f32.mrf.mxu0 }
 0x1c2   : > { %533 = vst [vmem:[%s236_s22] sm:$0xff] %v711_v2 }
 0x1c3   : > { %v518_v4 = vpop.f32.mrf.mxu0 }
 0x1c4   : > { %v712_v10 = vpack.c.bf16 %v518_v4, %v516_v5 }
 0x1c6   : > { %534 = vst [vmem:[%s236_s22 + $0x8] sm:$0xff] %v712_v10 }
 0x1c7   : > { %948 = shalt.err (!%p945_p9)
}
 0x1c8   : > { %s949_s20 = scalar_lea.hbm %s1260_s11, 256  ;;  %s953_s25 = scalar_lea.hbm %s1311_s3, 512 }
 0x1c9   : > { %p950_p8 = scmp.ne.s32.totalorder %s1260_s11, %s949_s20  ;;  %p954_p6 = scmp.lt.s32.totalorder %s1260_s11, %s1311_s3 }
 0x1ca   : > { %p955_p11 = scmp.lt.s32.totalorder %s953_s25, %s949_s20 }
 0x1cb   : > { %p951_p0 = pnand %p950_p8, %p1331_p12 }
 0x1cc   : > { %p956_p4 = por %p955_p11, %p954_p6 }
 0x1cd   : > { %p952_p10 = pneg %p951_p0 }
 0x1cf   : > { %p957_p7 = pnand %p956_p4, %p952_p10 }
 0x1d1   : > { %960 = shalt.err (!%p957_p7)
}
 0x1d2   : > { %s1032_s18 = smov 128   ;;  %s1033_s22 = smov 256  }
 0x1d3   : > { %s1034_s8 = smov 8  }
 0x1d4   : > { %724 = dma.vmem_to_hbm [thread:$0]  (%p1331_p12), %s1255_s28, 256, %s1260_s11, %s536_s19, %s1032_s18, %s1033_s22, %s1034_s8  }
 0x1d5 PF: > { %s567_s9 = sand.u32 1, %s1003_s12   ;;  %p1332_p2 = scmp.ne.s32.totalorder %s1320_s24, 0 }
 0x1d6   : > { %p1333_p13 = scmp.ge.s32.totalorder %s1023_s17, 2  ;;  %s568_s10 = scalar_lea.sflag [#allocation4], %s567_s9 }
 0x1d8   : > { %p738_p5 = pnand %p1333_p13, %p1332_p2 }
 0x1da   : > { %p739_p1 = pneg %p738_p5 }
 0x1dc   : > { %998 = dma.done.wait (%p739_p1), %s568_s10, 256  }
 0x1dd   : > { %1000 = vsyncadd (%p739_p1), %s568_s10, 4294967040  ;;  %s18_s17 = sadd.s32 1, %s1023_s17   ;;  %s1334_s12 = smov %s1007_s13 }
 0x1de   : > { %p15_p3 = scmp.ge.s32.totalorder %s18_s17, 4   ;;  %s1335_s13 = smov %s1011_s14 }
 0x1df   : > { %s1336_s14 = smov %s1172_s30  ;;  %s1337_s15 = smov %s1019_s16 }
 0x1e0   : > { %s1338_s16 = smov %s1340_s21  ;;  %17 = sbr.rel (!%p15_p3) target bundleno = 8 (0x8), region = 85 }
 0x1e5   :  { %573 = vsyncpa [#allocation3], 1 }
 0x1e6   :  { %575 = vsyncpa [#allocation3 + $0x1], 1 }
 0x1e7   :  { %576 = vsyncpa [#allocation6], 1 }
 0x1e8   :  { %577 = vsyncpa [#allocation4], 1 }
 0x1e9   :  { %579 = vsyncpa [#allocation4 + $0x1], 1 }

</bundles_post_ra>
